<compile_context>
chip_gen: v7x
topology: tpu7x:2x2x1
jax: 0.10.0
libtpu: 0.0.40
codegen_flags: <defaults>
</compile_context>

<pallas_src>
import jax
import jax.numpy as jnp
from jax.experimental import pallas as pl
from jax.experimental.pallas import tpu as pltpu

_LANES = 128


def _swish_kernel(beta_ref, x_ref, o_ref):
    # beta_ref: (1,) f32 scalar in SMEM; x_ref/o_ref: VMEM tiles.
    x = x_ref[...].astype(jnp.float32)
    beta = beta_ref[0]
    e = jnp.exp(-beta * x)                      # single exp on the EUP
    o_ref[...] = (x / (1.0 + e)).astype(o_ref.dtype)


def _round_up(a, b):
    return ((a + b - 1) // b) * b


def _vmem_capacity_bytes():
    try:
        return int(pltpu.get_tpu_info().vmem_capacity_bytes)
    except Exception:
        return 64 * 1024 * 1024  # conservative: v7x per-TensorCore VMEM


def _pick_tile(total, quantum, budget_units):
    """Block extent along the (single) grid axis, in elements/rows."""
    if total <= quantum:
        return total  # one block == full array: always a legal block shape
    tile = max(quantum, (budget_units // quantum) * quantum)
    tile = min(tile, _round_up(total, quantum))
    # v7x megacore: keep >= 2 grid steps so both TensorCores get work
    # (no-op on single-TC v5e/v6e; ragged last block is masked by Pallas).
    if pl.cdiv(total, tile) < 2:
        tile = max(quantum, _round_up(pl.cdiv(total, 2), quantum))
    return tile


def swish(x, beta=1.0):
    """Elementwise swish: x * sigmoid(beta * x). Any shape, float dtype."""
    orig_shape = x.shape
    dtype = x.dtype
    n = x.size
    if n == 0:
        return x
    itemsize = jnp.dtype(dtype).itemsize
    # Native packed sublane multiple: 8 (f32), 16 (bf16/f16), 32 (8-bit).
    sublane = max(8, 32 // itemsize)

    beta_arr = jnp.asarray(beta, dtype=jnp.float32).reshape((1,))

    # ~4 MiB blocks: 4 live buffers (double-buffered in + out) ~= 16 MiB,
    # inside every generation's VMEM; scoped limit raised for v5e's default.
    vmem_cap = _vmem_capacity_bytes()
    block_bytes = max(512 * 1024, min(vmem_cap // 16, 4 * 1024 * 1024))
    vmem_limit = int(min(vmem_cap // 2, 32 * 1024 * 1024))

    cost = pl.CostEstimate(
        flops=5 * n,
        transcendentals=n,
        bytes_accessed=2 * n * itemsize,
    )
    compiler_params = pltpu.CompilerParams(
        dimension_semantics=("parallel",),
        vmem_limit_bytes=vmem_limit,
    )
    beta_spec = pl.BlockSpec(memory_space=pltpu.MemorySpace.SMEM)

    x_flat = jnp.ravel(x)  # zero-copy for default-contiguous inputs

    if n % _LANES == 0:
        # Aligned path: zero-copy view as a lane-dense [rows, 128] slab.
        rows = n // _LANES
        x2d = x_flat.reshape(rows, _LANES)
        tile_rows = _pick_tile(rows, sublane, block_bytes // (_LANES * itemsize))
        out = pl.pallas_call(
            _swish_kernel,
            out_shape=jax.ShapeDtypeStruct((rows, _LANES), dtype),
            grid_spec=pl.GridSpec(
                grid=(pl.cdiv(rows, tile_rows),),
                in_specs=[
                    beta_spec,
                    pl.BlockSpec((tile_rows, _LANES), lambda i: (i, 0)),
                ],
                out_specs=pl.BlockSpec((tile_rows, _LANES), lambda i: (i, 0)),
            ),
            compiler_params=compiler_params,
            cost_estimate=cost,
        )(beta_arr, x2d)
    else:
        # Unaligned path: run on the flat 1-D array; the ragged final block
        # is masked by Pallas (no pad / slice HBM passes).
        chunk = sublane * _LANES
        tile = _pick_tile(n, chunk, block_bytes // itemsize)
        out = pl.pallas_call(
            _swish_kernel,
            out_shape=jax.ShapeDtypeStruct((n,), dtype),
            grid_spec=pl.GridSpec(
                grid=(pl.cdiv(n, tile),),
                in_specs=[beta_spec, pl.BlockSpec((tile,), lambda i: (i,))],
                out_specs=pl.BlockSpec((tile,), lambda i: (i,)),
            ),
            compiler_params=compiler_params,
            cost_estimate=cost,
        )(beta_arr, x_flat)

    return out.reshape(orig_shape)


class Swish:
    """JAX/Pallas equivalent of the PyTorch Swish module (forward pass)."""

    def __init__(self, beta=1.0):
        self.beta = beta

    def __call__(self, x):
        return swish(x, self.beta)


if __name__ == "__main__":
    key = jax.random.PRNGKey(0)
    # NCHW input, small shapes: batch=2, channels=4, spatial=16x16.
    x = jax.random.normal(key, (2, 4, 16, 16), dtype=jnp.float32)

    module = Swish(beta=1.0)
    out = jax.block_until_ready(module(x))

    ref = x * jax.nn.sigmoid(1.0 * x)
    assert out.shape == x.shape and out.dtype == x.dtype
    assert jnp.allclose(out, ref, atol=2e-6, rtol=1e-5)

    # Unaligned size exercises the 1-D (ragged) path, no pad/slice passes.
    x2 = jax.random.normal(key, (3, 5, 7), dtype=jnp.float32)
    out2 = jax.block_until_ready(module(x2))
    ref2 = x2 * jax.nn.sigmoid(1.0 * x2)
    assert out2.shape == x2.shape and jnp.allclose(out2, ref2, atol=2e-6, rtol=1e-5)

    # Non-default beta (still forward-equivalent to the PyTorch module).
    module_b = Swish(beta=1.7)
    x3 = jax.random.normal(key, (2, 4, 16, 16), dtype=jnp.float32)
    out3 = jax.block_until_ready(module_b(x3))
    ref3 = x3 * jax.nn.sigmoid(1.7 * x3)
    assert jnp.allclose(out3, ref3, atol=2e-6, rtol=1e-5)

    print("KERNEL_OK")
</pallas_src>

<mosaic_0001>
module attributes {stable_mosaic.version = 11 : i64} {
  func.func @_swish_kernel(%arg0: i32, %arg1: memref<1xf32, #tpu.memory_space<smem>>, %arg2: memref<8x128xf32, #tpu.memory_space<vmem>>, %arg3: memref<8x128xf32, #tpu.memory_space<vmem>>) attributes {dimension_semantics = [#tpu.dimension_semantics<parallel>], iteration_bounds = array<i64: 2>, scalar_prefetch = 0 : i64, scratch_operands = 0 : i64, tpu.core_type = #tpu.core_type<tc>, window_params = [{transform_indices = @transform_0, window_bounds = array<i64: 1>}, {transform_indices = @transform_1, window_bounds = array<i64: 8, 128>}, {transform_indices = @transform_2, window_bounds = array<i64: 8, 128>}]} {
    %c0 = arith.constant 0 : index
    %c0_0 = arith.constant 0 : index
    %0 = vector.load %arg2[%c0, %c0_0] : memref<8x128xf32, #tpu.memory_space<vmem>>, vector<8x128xf32>
    %c0_1 = arith.constant 0 : index
    %1 = memref.load %arg1[%c0_1] : memref<1xf32, #tpu.memory_space<smem>>
    %cst = arith.constant 0.000000e+00 : f32
    %2 = arith.subf %cst, %1 : f32
    %3 = vector.broadcast %2 : f32 to vector<8x128xf32>
    %4 = arith.mulf %3, %0 : vector<8x128xf32>
    %5 = math.exp %4 : vector<8x128xf32>
    %cst_2 = arith.constant 1.000000e+00 : f32
    %6 = vector.broadcast %cst_2 : f32 to vector<8x128xf32>
    %7 = arith.addf %6, %5 : vector<8x128xf32>
    %8 = arith.divf %0, %7 : vector<8x128xf32>
    %c0_3 = arith.constant 0 : index
    %c0_4 = arith.constant 0 : index
    %9 = vector.load %arg3[%c0_3, %c0_4] : memref<8x128xf32, #tpu.memory_space<vmem>>, vector<8x128xf32>
    tpu.vector_store %arg3[%c0_3, %c0_4], %8 {strides = array<i32>} : memref<8x128xf32, #tpu.memory_space<vmem>>, vector<8x128xf32>,
    return
  }
  func.func @transform_0(%arg0: i32) -> i32 {
    %c0_i32 = arith.constant 0 : i32
    %c0_i32_0 = arith.constant 0 : i32
    return %c0_i32 : i32
  }
  func.func @transform_1(%arg0: i32) -> (i32, i32) {
    %c0_i32 = arith.constant 0 : i32
    %c0_i32_0 = arith.constant 0 : i32
    return %arg0, %c0_i32 : i32, i32
  }
  func.func @transform_2(%arg0: i32) -> (i32, i32) {
    %c0_i32 = arith.constant 0 : i32
    %c0_i32_0 = arith.constant 0 : i32
    return %arg0, %c0_i32 : i32, i32
  }
}

</mosaic_0001>

<bundles_post_ra>
// kernel: tpu_custom_call.1
= control target key start
LH: loop header
LB: loop body
LE: loop exit
PB: predicated region body
PF: predicated region fallthrough
CT: control target
= control target key end

     0   :  { %s596_s0 = inlined_call_operand.<no memory space> [shape: f32[1], index: 0, kind: input, shape index: {}]   ;;  %s597_s1 = inlined_call_operand.hbm [shape: f32[16,128], index: 1, kind: input, shape index: {}]   ;;  %s598_s2 = inlined_call_operand.hbm [shape: f32[16,128], index: 2, kind: output, shape index: {}]  }
   0x1   :  { %7 = sst [smem:[#allocation2]] %s596_s0 }
   0x2   :  { %8 = vsyncpa [#allocation4], 0 }
   0x3   :  { %10 = vsyncpa [#allocation4 + $0x1], 0 }
   0x4   :  { %11 = vsyncpa [#allocation5], 0 }
   0x5   :  { %13 = vsyncpa [#allocation5 + $0x1], 0  ;;  %s435_s11 = smov 0   ;;  %s437_s12 = smov 0  }
   0x6   :  { %s439_s13 = smov 0   ;;  %s441_s14 = smov 0  }
   0x7 LB: > { %s456_s0 = sadd.s32 4294967295, %s413_s14   ;;  %s255_s15 = sadd.s32 4294967294, %s413_s14   ;;  %s413_s14 = sphi %s441_s14, %s613_s14   ;;  %s409_s13 = sphi %s439_s13, %s612_s13   ;;  %s405_s12 = sphi %s437_s12, %s611_s12   ;;  %s401_s11 = sphi %s435_s11, %s610_s11  }
   0x8   : > { %s460_s16 = sadd.s32 1, %s413_s14   ;;  %s47_s17 = sadd.s32 1, %s409_s13 }
   0x9   : > { %s44_s18 = ssub.s32 %s413_s14, %s460_s16  ;;  %p54_p0 = scmp.ne.s32.totalorder %s409_s13, %s405_s12 }
   0xa   : > { %p45_p1 = scmp.eq.s32.totalorder %s44_s18, 0  ;;  %p55_p2 = scmp.eq.s32.totalorder %s413_s14, 0 }
   0xb   : > { %p60_p3 = scmp.ne.s32.totalorder %s405_s12, %s401_s11  ;;  %p61_p4 = scmp.eq.s32.totalorder %s456_s0, 0 }
   0xc   : > { %s472_s19 = scalar_select %p45_p1, %s409_s13, %s47_s17  }
   0xd   : > { %p474_p5 = por %p55_p2, %p54_p0  ;;  %p478_p6 = por %p61_p4, %p60_p3 }
   0xe   : > { %p84_p7 = scmp.eq.s32.totalorder %s456_s0, 1  ;;  %p90_p8 = scmp.eq.s32.totalorder %s255_s15, 1 }
   0xf   : > { %p279_p10 = scmp.lt.s32.totalorder %s413_s14, 2  ;;  %s113_s24 = sand.u32 1, %s409_s13  }
  0x10   : > { %p485_p11 = por %p84_p7, %p54_p0  ;;  %p489_p12 = por %p90_p8, %p60_p3 }
  0x11   : > { %s259_s25 = sshll.u32 %s413_s14, 7  ;;  %s258_s26 = sshll.u32 %s113_s24, 3 }
  0x12   : > { %s602_s22 = scalar_select %p485_p11, 1, 0 }
  0x13   : > { %s603_s23 = scalar_select %p489_p12, 1, 0 }
  0x14   : > { %s498_s29 = scalar_lea.hbm %s597_s1, %s259_s25  ;;  %s117_s30 = scalar_lea.vmem [#allocation3], %s258_s26 }
  0x15   : > { %s124_s3 = sshll.u32 %s117_s30, 4  ;;  %p502_p13 = pnand %p279_p10, %p474_p5  ;;  %s506_s3 = int_to_ptr.vmem [resolvable:$true] %s124_s3 }
  0x16   : > { %s114_s5 = scalar_lea.sflag [#allocation4], %s113_s24  ;;  %s317_s6 = scalar_lea.hbm %s498_s29, 128 }
  0x17   : > { %p318_p2 = scmp.ne.s32.totalorder %s498_s29, %s317_s6  ;;  %p319_p3 = pneg %p502_p13 }
  0x18   : > { %s322_s9 = scalar_lea.hbm %s597_s1, 256  ;;  %p323_p5 = scmp.lt.u32.totalorder %s498_s29, %s597_s1 }
  0x19   : > { %p320_p4 = pnand %p319_p3, %p318_p2  ;;  %p324_p8 = scmp.lt.u32.totalorder %s322_s9, %s317_s6 }
  0x1a   : > { %p326_p9 = scmp.lt.u32.totalorder %s317_s6, %s498_s29 }
  0x1b   : > { %p321_p7 = pneg %p320_p4  ;;  %p325_p10 = por %p324_p8, %p323_p5 }
  0x1d   : > { %p327_p0 = por %p326_p9, %p325_p10 }
  0x1f   : > { %p328_p1 = pnand %p327_p0, %p321_p7 }
  0x21   : > { %331 = shalt.err (!%p328_p1)
}
  0x22   : > { %s332_s17 = scalar_lea.vmem %s506_s3, 128  ;;  %s415_s18 = smov [#allocation3]  }
  0x23   : > { %p333_p2 = scmp.ne.s32.totalorder %s506_s3, %s332_s17  ;;  %s337_s20 = sshll.u32 %s415_s18, 4  ;;  %s338_s20 = int_to_ptr.vmem [resolvable:$false] %s337_s20 }
  0x24   : > { %s339_s24 = scalar_lea.vmem %s338_s20, 256  ;;  %p340_p11 = scmp.lt.s32.totalorder %s506_s3, %s338_s20 }
  0x25   : > { %p335_p4 = pnand %p333_p2, %p319_p3  ;;  %p341_p5 = scmp.lt.s32.totalorder %s339_s24, %s332_s17 }
  0x27   : > { %p336_p12 = pneg %p335_p4  ;;  %p342_p8 = por %p341_p5, %p340_p11 }
  0x29   : > { %p343_p9 = pnand %p342_p8, %p336_p12 }
  0x2b   : > { %346 = shalt.err (!%p343_p9)
}
  0x2c   : > { %274 = dma.hbm_to_vmem [thread:$0]  (!%p502_p13), %s498_s29, 128, %s506_s3, %s114_s5  }
  0x2d   : > { %p605_p0 = scmp.lt.s32.totalorder %s413_s14, 3  ;;  %p606_p1 = scmp.ge.s32.totalorder %s413_s14, 1 }
  0x2f   : > { %p130_p3 = pnand %p606_p1, %p605_p0 }
  0x30   : > { %s540_s25 = sand.u32 (!%p130_p3), 1, %s405_s12  }
  0x31   : > { %133 = sbr.rel (%p130_p3) target bundleno = 110 (0x6e), region = 28  ;;  %s261_s26 = sshll.u32 (!%p130_p3), %s540_s25, 3 }
  0x32   : > { %s136_s27 = scalar_lea.sflag (!%p130_p3), [#allocation4], %s540_s25  ;;  %s139_s28 = scalar_lea.vmem (!%p130_p3), [#allocation3], %s261_s26 }
  0x38   : > { %392 = dma.done.wait (%p478_p6), %s136_s27, 128  }
  0x39   : > { %394 = vsyncadd (%p478_p6), %s136_s27, 4294967168  ;;  %s161_s29 = sld [smem:[#allocation2]]  ;;  %v160_v0 = vld [vmem:[%s139_s28] sm:$0xff]  ;;  %s159_s3 = scalar_lea.vmem [#allocation6], %s261_s26 }
  0x3a   : > { %s185_s4 = sshll.u32 %s159_s3, 4  ;;  %s264_s5 = sshll.u32 %s456_s0, 7  ;;  %s549_s4 = int_to_ptr.vmem [resolvable:$true] %s185_s4 }
  0x3b   : > { %s554_s7 = scalar_lea.hbm %s598_s2, %s264_s5  ;;  %s172_s8 = scalar_lea.sflag [#allocation5], %s540_s25 }
  0x3c   : > { %s347_s9 = scalar_lea.vmem %s549_s4, 128  ;;  %p607_p11 = scmp.ne.s32.totalorder %s602_s22, 0 }
  0x3d   : > { %p348_p6 = scmp.ne.s32.totalorder %s549_s4, %s347_s9  ;;  %s416_s0 = smov [#allocation6]  }
  0x3e   : > { %s351_s10 = sshll.u32 %s416_s0, 4  ;;  %s352_s10 = int_to_ptr.vmem [resolvable:$false] %s351_s10 }
  0x3f   : > { %s162_s30 = ssub.f32 0.0, %s161_s29  ;;  %p349_p12 = pnand %p348_p6, %p607_p11 }
  0x40   : > { %s353_s15 = scalar_lea.vmem %s352_s10, 256  ;;  %p354_p7 = scmp.lt.s32.totalorder %s549_s4, %s352_s10 }
  0x41   : > { %v163_v1 = vstv %s162_s30  ;;  %p350_p13 = pneg %p349_p12  ;;  %p355_p10 = scmp.lt.s32.totalorder %s353_s15, %s347_s9 }
  0x42   : > { %v164_v2 = vmul.f32 %v163_v1, %v160_v0 }
  0x43   : > { %p356_p2 = por %p355_p10, %p354_p7 }
  0x44   : > { %v165_v3 = vmul.f32 1.442695, %v164_v2 }
  0x45   : > { %p357_p4 = pnand %p356_p2, %p350_p13 }
  0x46   : > { %313 = vpow2.f32 %v165_v3 }
  0x50   : > { %v314_v4 = vpop.eup %313 }
  0x51   : > { %v167_v5 = vadd.f32 1.0, %v314_v4 }
  0x53   : > { %315 = vrcp.f32 %v167_v5 }
  0x5d   : > { %v316_v6 = vpop.eup %315 }
  0x5e   : > { %v169_v7 = vmul.f32 %v316_v6, %v160_v0 }
  0x60   : > { %170 = vst [vmem:[%s159_s3] sm:$0xff] %v169_v7 }
  0x61   : > { %360 = shalt.err (!%p357_p4)
}
  0x62   : > { %s361_s17 = scalar_lea.hbm %s554_s7, 128  ;;  %s365_s24 = scalar_lea.hbm %s598_s2, 256 }
  0x63   : > { %p362_p5 = scmp.ne.s32.totalorder %s554_s7, %s361_s17  ;;  %p366_p0 = scmp.lt.u32.totalorder %s554_s7, %s598_s2 }
  0x64   : > { %p367_p1 = scmp.lt.u32.totalorder %s365_s24, %s361_s17  ;;  %p369_p6 = scmp.lt.u32.totalorder %s361_s17, %s554_s7 }
  0x65   : > { %p363_p8 = pnand %p362_p5, %p607_p11 }
  0x66   : > { %p368_p3 = por %p367_p1, %p366_p0 }
  0x67   : > { %p364_p9 = pneg %p363_p8 }
  0x68   : > { %p370_p12 = por %p369_p6, %p368_p3 }
  0x6a   : > { %p371_p13 = pnand %p370_p12, %p364_p9 }
  0x6c   : > { %374 = shalt.err (!%p371_p13)
}
  0x6d   : > { %269 = dma.vmem_to_hbm [thread:$0]  (%p607_p11), %s549_s4, 128, %s554_s7, %s172_s8  }
  0x6e PF: > { %s197_s27 = sand.u32 1, %s401_s11   ;;  %p608_p7 = scmp.ne.s32.totalorder %s603_s23, 0 }
  0x6f   : > { %p609_p10 = scmp.ge.s32.totalorder %s413_s14, 2  ;;  %s198_s28 = scalar_lea.sflag [#allocation5], %s197_s27 }
  0x71   : > { %p276_p2 = pnand %p609_p10, %p608_p7 }
  0x73   : > { %396 = dma.done.wait (!%p276_p2), %s198_s28, 128  }
  0x74   : > { %398 = vsyncadd (!%p276_p2), %s198_s28, 4294967168  ;;  %p16_p4 = scmp.ge.s32.totalorder %s460_s16, 4   ;;  %s610_s11 = smov %s405_s12 }
  0x75   : > { %s611_s12 = smov %s409_s13  ;;  %s612_s13 = smov %s472_s19 }
  0x76   : > { %s613_s14 = smov %s460_s16  ;;  %18 = sbr.rel (!%p16_p4) target bundleno = 7 (0x7), region = 73 }
  0x7d   :  { %203 = vsyncpa [#allocation4], 1 }
  0x7e   :  { %205 = vsyncpa [#allocation4 + $0x1], 1 }
  0x7f   :  { %206 = vsyncpa [#allocation5], 1 }
  0x80   :  { %208 = vsyncpa [#allocation5 + $0x1], 1 }

</bundles_post_ra>
